<compile_context>
chip_gen: v7x
topology: tpu7x:2x2x1
jax: 0.10.0
libtpu: 0.0.40
codegen_flags: <defaults>
</compile_context>

<pallas_src>
import jax
import jax.numpy as jnp
from jax.experimental import pallas as pl
from jax.experimental.pallas import tpu as pltpu


def rnn_kernel(x_ref, wih_ref, whh_ref, b_ref, wfc_ref, bfc_ref, out_ref):
    # x_ref:   (T*B, I)  time-major rows (rows t*B : (t+1)*B are timestep t)
    # wih_ref: (I, H)    = W_ih^T
    # whh_ref: (H, H)    = W_hh^T
    # b_ref:   (1, H)    = b_ih + b_hh
    # wfc_ref: (1, H)    = W_fc (row vector)
    # bfc_ref: (1, 1)
    # out_ref: (B, 1)
    B = out_ref.shape[0]
    TB = x_ref.shape[0]
    T = TB // B
    H = whh_ref.shape[0]

    # Hoisted input projection for ALL timesteps in a single MXU call.
    # (T*B, I) @ (I, H) + b  ->  (T*B, H)
    xp = (jnp.dot(x_ref[...], wih_ref[...], preferred_element_type=jnp.float32)
          + b_ref[...])

    # Load the recurrent weight once; it stays in vregs/VMEM for the loop.
    whh = whh_ref[...]

    # Sequential recurrence, fully unrolled (T is static at trace time).
    h = jnp.zeros((B, H), jnp.float32)
    for t in range(T):
        h = jnp.tanh(xp[t * B:(t + 1) * B, :]
                     + jnp.dot(h, whh, preferred_element_type=jnp.float32))

    # Final Linear(H, 1): VPU multiply + lane (XLU) reduction instead of an
    # N=1 MXU matmul.
    out_ref[...] = (jnp.sum(h * wfc_ref[...], axis=-1, keepdims=True)
                    + bfc_ref[...]).astype(out_ref.dtype)


def simple_rnn_forward(x, w_ih, w_hh, b_ih, b_hh, w_fc, b_fc):
    """x: (B, T, I) float32 (batch_first, like PyTorch). Returns (B, 1)."""
    B, T, I = x.shape
    H = w_ih.shape[0]

    # Parameter / layout glue in plain JAX (outside the kernel).
    x_tm = jnp.transpose(x, (1, 0, 2)).reshape(T * B, I)   # time-major rows
    wih_t = w_ih.T                                         # (I, H)
    whh_t = w_hh.T                                         # (H, H)
    b = (b_ih + b_hh).reshape(1, H)                        # (1, H)
    wfc_row = w_fc.reshape(1, H)                           # (1, H)
    bfc = b_fc.reshape(1, 1)                               # (1, 1)

    vmem = pl.BlockSpec(memory_space=pltpu.MemorySpace.VMEM)  # whole array in VMEM

    return pl.pallas_call(
        rnn_kernel,
        out_shape=jax.ShapeDtypeStruct((B, 1), jnp.float32),
        in_specs=[vmem] * 6,
        out_specs=vmem,
    )(x_tm, wih_t, whh_t, b, wfc_row, bfc)


def simple_rnn_reference(x, w_ih, w_hh, b_ih, b_hh, w_fc, b_fc):
    """Pure-JAX reference matching PyTorch nn.RNN + Linear semantics."""
    B, T, I = x.shape
    H = w_ih.shape[0]
    h = jnp.zeros((B, H), jnp.float32)

    def step(h, x_t):
        h_new = jnp.tanh(x_t @ w_ih.T + b_ih + h @ w_hh.T + b_hh)
        return h_new, None

    h_last, _ = jax.lax.scan(step, h, jnp.transpose(x, (1, 0, 2)))
    return h_last @ w_fc.T + b_fc


if __name__ == "__main__":
    B, T, I, H = 2, 8, 4, 32

    key = jax.random.PRNGKey(0)
    ks = jax.random.split(key, 7)
    scale = 1.0 / jnp.sqrt(H)
    w_ih = jax.random.uniform(ks[0], (H, I), jnp.float32, -scale, scale)
    w_hh = jax.random.uniform(ks[1], (H, H), jnp.float32, -scale, scale)
    b_ih = jax.random.uniform(ks[2], (H,), jnp.float32, -scale, scale)
    b_hh = jax.random.uniform(ks[3], (H,), jnp.float32, -scale, scale)
    w_fc = jax.random.uniform(ks[4], (1, H), jnp.float32, -scale, scale)
    b_fc = jax.random.uniform(ks[5], (1,), jnp.float32, -scale, scale)
    x = jax.random.normal(ks[6], (B, T, I), jnp.float32)

    out = simple_rnn_forward(x, w_ih, w_hh, b_ih, b_hh, w_fc, b_fc)
    out = jax.block_until_ready(out)

    ref = simple_rnn_reference(x, w_ih, w_hh, b_ih, b_hh, w_fc, b_fc)
    assert out.shape == (B, 1)
    assert jnp.allclose(out, ref, atol=1e-5, rtol=1e-5)

    print("KERNEL_OK")
</pallas_src>

<mosaic_0001>
module attributes {stable_mosaic.version = 11 : i64} {
  func.func @rnn_kernel(%arg0: memref<16x4xf32, #tpu.memory_space<vmem>>, %arg1: memref<4x32xf32, #tpu.memory_space<vmem>>, %arg2: memref<32x32xf32, #tpu.memory_space<vmem>>, %arg3: memref<1x32xf32, #tpu.memory_space<vmem>>, %arg4: memref<1x32xf32, #tpu.memory_space<vmem>>, %arg5: memref<1x1xf32, #tpu.memory_space<vmem>>, %arg6: memref<2x1xf32, #tpu.memory_space<vmem>>) attributes {dimension_semantics = [], scalar_prefetch = 0 : i64, scratch_operands = 0 : i64, tpu.core_type = #tpu.core_type<tc>} {
    %c0 = arith.constant 0 : index
    %c0_0 = arith.constant 0 : index
    %0 = vector.load %arg0[%c0, %c0_0] : memref<16x4xf32, #tpu.memory_space<vmem>>, vector<16x4xf32>
    %c0_1 = arith.constant 0 : index
    %c0_2 = arith.constant 0 : index
    %1 = vector.load %arg1[%c0_1, %c0_2] : memref<4x32xf32, #tpu.memory_space<vmem>>, vector<4x32xf32>
    %cst = arith.constant dense<0.000000e+00> : vector<16x32xf32>
    %2 = tpu.matmul %0, %1, %cst {dimension_numbers = #tpu.dot_dimension_numbers<[1], [0], [0], [1], [0, 0, 1, 1], [], []>} : vector<16x4xf32>, vector<4x32xf32>, vector<16x32xf32> -> vector<16x32xf32>
    %c0_3 = arith.constant 0 : index
    %c0_4 = arith.constant 0 : index
    %3 = vector.load %arg3[%c0_3, %c0_4] : memref<1x32xf32, #tpu.memory_space<vmem>>, vector<1x32xf32>
    %4 = vector.broadcast %3 : vector<1x32xf32> to vector<16x32xf32>
    %5 = arith.addf %2, %4 : vector<16x32xf32>
    %c0_5 = arith.constant 0 : index
    %c0_6 = arith.constant 0 : index
    %6 = vector.load %arg2[%c0_5, %c0_6] : memref<32x32xf32, #tpu.memory_space<vmem>>, vector<32x32xf32>
    %cst_7 = arith.constant 0.000000e+00 : f32
    %7 = vector.broadcast %cst_7 : f32 to vector<2x32xf32>
    %8 = vector.extract_strided_slice %5 {offsets = [0, 0], sizes = [2, 32], strides = [1, 1]} : vector<16x32xf32> to vector<2x32xf32>
    %cst_8 = arith.constant dense<0.000000e+00> : vector<2x32xf32>
    %9 = tpu.matmul %7, %6, %cst_8 {dimension_numbers = #tpu.dot_dimension_numbers<[1], [0], [0], [1], [0, 0, 1, 1], [], []>} : vector<2x32xf32>, vector<32x32xf32>, vector<2x32xf32> -> vector<2x32xf32>
    %10 = arith.addf %8, %9 : vector<2x32xf32>
    %11 = math.tanh %10 : vector<2x32xf32>
    %12 = vector.extract_strided_slice %5 {offsets = [2, 0], sizes = [2, 32], strides = [1, 1]} : vector<16x32xf32> to vector<2x32xf32>
    %cst_9 = arith.constant dense<0.000000e+00> : vector<2x32xf32>
    %13 = tpu.matmul %11, %6, %cst_9 {dimension_numbers = #tpu.dot_dimension_numbers<[1], [0], [0], [1], [0, 0, 1, 1], [], []>} : vector<2x32xf32>, vector<32x32xf32>, vector<2x32xf32> -> vector<2x32xf32>
    %14 = arith.addf %12, %13 : vector<2x32xf32>
    %15 = math.tanh %14 : vector<2x32xf32>
    %16 = vector.extract_strided_slice %5 {offsets = [4, 0], sizes = [2, 32], strides = [1, 1]} : vector<16x32xf32> to vector<2x32xf32>
    %cst_10 = arith.constant dense<0.000000e+00> : vector<2x32xf32>
    %17 = tpu.matmul %15, %6, %cst_10 {dimension_numbers = #tpu.dot_dimension_numbers<[1], [0], [0], [1], [0, 0, 1, 1], [], []>} : vector<2x32xf32>, vector<32x32xf32>, vector<2x32xf32> -> vector<2x32xf32>
    %18 = arith.addf %16, %17 : vector<2x32xf32>
    %19 = math.tanh %18 : vector<2x32xf32>
    %20 = vector.extract_strided_slice %5 {offsets = [6, 0], sizes = [2, 32], strides = [1, 1]} : vector<16x32xf32> to vector<2x32xf32>
    %cst_11 = arith.constant dense<0.000000e+00> : vector<2x32xf32>
    %21 = tpu.matmul %19, %6, %cst_11 {dimension_numbers = #tpu.dot_dimension_numbers<[1], [0], [0], [1], [0, 0, 1, 1], [], []>} : vector<2x32xf32>, vector<32x32xf32>, vector<2x32xf32> -> vector<2x32xf32>
    %22 = arith.addf %20, %21 : vector<2x32xf32>
    %23 = math.tanh %22 : vector<2x32xf32>
    %24 = vector.extract_strided_slice %5 {offsets = [8, 0], sizes = [2, 32], strides = [1, 1]} : vector<16x32xf32> to vector<2x32xf32>
    %cst_12 = arith.constant dense<0.000000e+00> : vector<2x32xf32>
    %25 = tpu.matmul %23, %6, %cst_12 {dimension_numbers = #tpu.dot_dimension_numbers<[1], [0], [0], [1], [0, 0, 1, 1], [], []>} : vector<2x32xf32>, vector<32x32xf32>, vector<2x32xf32> -> vector<2x32xf32>
    %26 = arith.addf %24, %25 : vector<2x32xf32>
    %27 = math.tanh %26 : vector<2x32xf32>
    %28 = vector.extract_strided_slice %5 {offsets = [10, 0], sizes = [2, 32], strides = [1, 1]} : vector<16x32xf32> to vector<2x32xf32>
    %cst_13 = arith.constant dense<0.000000e+00> : vector<2x32xf32>
    %29 = tpu.matmul %27, %6, %cst_13 {dimension_numbers = #tpu.dot_dimension_numbers<[1], [0], [0], [1], [0, 0, 1, 1], [], []>} : vector<2x32xf32>, vector<32x32xf32>, vector<2x32xf32> -> vector<2x32xf32>
    %30 = arith.addf %28, %29 : vector<2x32xf32>
    %31 = math.tanh %30 : vector<2x32xf32>
    %32 = vector.extract_strided_slice %5 {offsets = [12, 0], sizes = [2, 32], strides = [1, 1]} : vector<16x32xf32> to vector<2x32xf32>
    %cst_14 = arith.constant dense<0.000000e+00> : vector<2x32xf32>
    %33 = tpu.matmul %31, %6, %cst_14 {dimension_numbers = #tpu.dot_dimension_numbers<[1], [0], [0], [1], [0, 0, 1, 1], [], []>} : vector<2x32xf32>, vector<32x32xf32>, vector<2x32xf32> -> vector<2x32xf32>
    %34 = arith.addf %32, %33 : vector<2x32xf32>
    %35 = math.tanh %34 : vector<2x32xf32>
    %36 = vector.extract_strided_slice %5 {offsets = [14, 0], sizes = [2, 32], strides = [1, 1]} : vector<16x32xf32> to vector<2x32xf32>
    %cst_15 = arith.constant dense<0.000000e+00> : vector<2x32xf32>
    %37 = tpu.matmul %35, %6, %cst_15 {dimension_numbers = #tpu.dot_dimension_numbers<[1], [0], [0], [1], [0, 0, 1, 1], [], []>} : vector<2x32xf32>, vector<32x32xf32>, vector<2x32xf32> -> vector<2x32xf32>
    %38 = arith.addf %36, %37 : vector<2x32xf32>
    %39 = math.tanh %38 : vector<2x32xf32>
    %c0_16 = arith.constant 0 : index
    %c0_17 = arith.constant 0 : index
    %40 = vector.load %arg4[%c0_16, %c0_17] : memref<1x32xf32, #tpu.memory_space<vmem>>, vector<1x32xf32>
    %41 = vector.broadcast %40 : vector<1x32xf32> to vector<2x32xf32>
    %42 = arith.mulf %39, %41 : vector<2x32xf32>
    %cst_18 = arith.constant dense<0.000000e+00> : vector<2xf32>
    %43 = vector.multi_reduction <add>, %42, %cst_18 [1] : vector<2x32xf32> to vector<2xf32>
    %44 = vector.shape_cast %43 : vector<2xf32> to vector<2x1xf32>
    %c0_19 = arith.constant 0 : index
    %c0_20 = arith.constant 0 : index
    %45 = vector.load %arg5[%c0_19, %c0_20] : memref<1x1xf32, #tpu.memory_space<vmem>>, vector<1x1xf32>
    %46 = vector.broadcast %45 : vector<1x1xf32> to vector<2x1xf32>
    %47 = arith.addf %44, %46 : vector<2x1xf32>
    %c0_21 = arith.constant 0 : index
    %c0_22 = arith.constant 0 : index
    %48 = vector.load %arg6[%c0_21, %c0_22] : memref<2x1xf32, #tpu.memory_space<vmem>>, vector<2x1xf32>
    tpu.vector_store %arg6[%c0_21, %c0_22], %47 {strides = array<i32>} : memref<2x1xf32, #tpu.memory_space<vmem>>, vector<2x1xf32>,
    return
  }
}

</mosaic_0001>

<bundles_post_ra>
// kernel: tpu_custom_call.1
= control target key start
LH: loop header
LB: loop body
LE: loop exit
PB: predicated region body
PF: predicated region fallthrough
CT: control target
= control target key end

     0   :  { %s1173_s0 = inlined_call_operand.vmem [shape: f32[16,4], index: 0, kind: input, shape index: {}]   ;;  %s1174_s1 = inlined_call_operand.vmem [shape: f32[4,32], index: 1, kind: input, shape index: {}]   ;;  %s1175_s2 = inlined_call_operand.hbm [shape: f32[32,32], index: 2, kind: input, shape index: {}]   ;;  %s1176_s3 = inlined_call_operand.vmem [shape: f32[1,32], index: 3, kind: input, shape index: {}]   ;;  %s1177_s4 = inlined_call_operand.vmem [shape: f32[1,32], index: 4, kind: input, shape index: {}]   ;;  %s1178_s5 = inlined_call_operand.<no memory space> [shape: f32[1,1], index: 5, kind: input, shape index: {}]   ;;  %s1179_s6 = inlined_call_operand.vmem [shape: f32[2,1], index: 6, kind: output, shape index: {}]  }
   0x1   :  { %v11_v0 = vstv %s1178_s5 }
   0x2   :  { %12 = vst [vmem:[#allocation2] sm:$0x1] %v11_v0 }
   0x3   :  { %13 = vsyncpa [#allocation4], 0  ;;  %s1033_s23 = smov [#allocation3]   ;;  %s1009_s27 = scalar_lea.hbm %s1175_s2, 512 }
   0x4   :  { %s23_s24 = sshll.u32 %s1033_s23, 4  ;;  %p1010_p0 = scmp.ne.s32.totalorder %s1175_s2, %s1009_s27  ;;  %s24_s24 = int_to_ptr.vmem [resolvable:$true] %s23_s24 }
   0x5   :  { %p1013_p1 = scmp.lt.u32.totalorder %s1009_s27, %s1175_s2 }
   0x7   :  { %p1015_p2 = pnand %p1013_p1, %p1010_p0 }
   0x9   :  { %1018 = shalt.err (!%p1015_p2)
}
   0xa   :  { %s1019_s5 = scalar_lea.vmem %s24_s24, 512  ;;  %p1024_p4 = scmp.lt.s32.totalorder %s24_s24, %s24_s24 }
   0xb   :  { %p1020_p3 = scmp.ne.s32.totalorder %s24_s24, %s1019_s5  ;;  %p1025_p5 = scmp.lt.s32.totalorder %s1019_s5, %s1019_s5 }
   0xd   :  { %p1026_p6 = por %p1025_p5, %p1024_p4 }
   0xf   :  { %p1027_p7 = pnand %p1026_p6, %p1020_p3 }
  0x11   :  { %1030 = shalt.err (!%p1027_p7)
}
  0x12   :  { %s1034_s8 = smov 128   ;;  %s1035_s9 = smov 8  }
  0x13   :  { %29 = dma.hbm_to_vmem [thread:$0]  %s1175_s2, 512, %s24_s24, [#allocation4], %s1034_s8, %s1034_s8, %s1035_s9  }
  0x14   :  { %1031 = dma.done.wait [#allocation4], 512  }
  0x15   :  { %1032 = vsyncadd [#allocation4], 4294966784  ;;  %v1036_v1 = vmov 0.0|0.0   ;;  %vm1037_vm0 = vmmov 0   ;;  %v1038_v2 = vmov 0.0   ;;  %vm56_vm1 = vcmask 1043456  }
  0x16   :  { %939 = vmatprep.subr.bf16.mxu1 %v1036_v1  ;;  %859 = vmatprep.mubr.msk.f32.mxu1 %vm1037_vm0, %v1038_v2  ;;  %vm49_vm2 = vcmask 31744   ;;  %v135_v3 = vld [vmem:[#allocation3] sm:$0xff]  ;;  %v136_v4 = vld [vmem:[#allocation3 + $0x8] sm:$0xff]  ;;  %v137_v9 = vld [vmem:[#allocation3 + $0x10] sm:$0xff]  ;;  %vm139_vm3 = vcmask 261120   ;;  %vm771_vm4 = vcmask 261126  }
  0x17   :  { %v41_v5 = vld [vmem:[%s1174_s1] sm:$0xf]  ;;  %v1095_v6 = vpack.c.bf16 %v136_v4, %v135_v3  ;;  %v40_v8 = vld [vmem:[%s1173_s0 + $0x8] sm:$0xff]  ;;  %vm783_vm5 = vcmask 7174  }
  0x18   :  { %846 = vmatprep.subr.msk.mxu0 %vm56_vm1, %v41_v5  ;;  %v39_v7 = vld [vmem:[%s1173_s0] sm:$0xff] }
  0x19   :  { %847 = vmatpush3.msk.msra.mxu0 %vm56_vm1, %v41_v5  ;;  %848 = vmatprep.mubr.msk.f32.mxu0 %vm49_vm2, %v39_v7  ;;  %v138_v10 = vld [vmem:[#allocation3 + $0x18] sm:$0xff] }
  0x1a   :  { %941 = vmatpush3.bf16.msra.mxu1 %v1095_v6  ;;  %849 = vmatmul.mubr.msk.f32.vlgmr.msra.gmra.mrb[0].mxu0 %vm49_vm2, %v40_v8  ;;  %v1104_v11 = vpack.c.bf16 %v138_v10, %v137_v9  ;;  %v790_v12 = vld [vmem:[%s1176_s3] ss:$0 sm:$0xff] }
  0x1b   :  { %942 = vmatprep.subr.bf16.mxu1 %v1036_v1  ;;  %945 = vmatprep.subr.bf16.mxu0 %v1036_v1  ;;  %v801_v59 = vld [vmem:[%s1177_s4] ss:$0 sm:$0xff] }
  0x1c   :  { %947 = vmatpush3.bf16.msra.mxu0 %v1095_v6  ;;  %870 = vmatprep.mubr.msk.f32.mxu0 %vm1037_vm0, %v1038_v2  ;;  %v802_v63 = vld [vmem:[#allocation2] ss:$0 sm:$0xff] }
  0x1d   :  { %948 = vmatprep.subr.bf16.mxu0 %v1036_v1 }
  0x1e   :  { %944 = vmatpush3.bf16.msra.mxu1 %v1104_v11 }
  0x1f   :  { %951 = vmatprep.subr.bf16.mxu1 %v1036_v1 }
  0x20   :  { %950 = vmatpush3.bf16.msra.mxu0 %v1104_v11 }
  0x21   :  { %860 = vmatmul.mubr.f32.vlgmr.msra.gmra.mrb[0].mxu1 %v1038_v2  ;;  %957 = vmatprep.subr.bf16.mxu0 %v1036_v1 }
  0x22   :  { %953 = vmatpush3.bf16.msra.mxu1 %v1095_v6  ;;  %881 = vmatprep.mubr.msk.f32.mxu1 %vm1037_vm0, %v1038_v2 }
  0x23   :  { %954 = vmatprep.subr.bf16.mxu1 %v1036_v1 }
  0x26   :  { %956 = vmatpush3.bf16.msra.mxu1 %v1104_v11 }
  0x27   :  { %963 = vmatprep.subr.bf16.mxu1 %v1036_v1 }
  0xed   :  { %v850_v13 = vpop.f32.mrb[0].mxu0 }
  0xee   :  { %v1126_v14 = vadd.f32 %v850_v13, %v790_v12  ;;  %v126_v15 = vpop.f32.mrb[1].mxu0 }
  0xef   :  { %v127_v16 = vadd.f32 %v790_v12, %v126_v15 }
  0xf4   :  { %v209_v17 = vpop.f32.mrb[0].mxu1 }
  0xf5   :  { %v213_v18 = vadd.f32 %v209_v17, %v127_v16  ;;  %v861_v19 = vpop.f32.mrb[1].mxu1 }
  0xf7   :  { %993 = vtanh.f32 %v213_v18 }
 0x101   :  { %v994_v20 = vpop.eup %993 }
 0x102   :  { %871 = vmatmul.mubr.msk.f32.vlgmr.msra.gmra.mrb[2].mxu0 %vm139_vm3, %v994_v20 }
 0x103   :  { %959 = vmatpush3.bf16.msra.mxu0 %v1095_v6  ;;  %892 = vmatprep.mubr.msk.f32.mxu0 %vm1037_vm0, %v1038_v2 }
 0x104   :  { %960 = vmatprep.subr.bf16.mxu0 %v1036_v1 }
 0x107   :  { %962 = vmatpush3.bf16.msra.mxu0 %v1104_v11 }
 0x108   :  { %969 = vmatprep.subr.bf16.mxu0 %v1036_v1 }
 0x1d5   :  { %v284_v21 = vpop.f32.mrb[2].mxu0 }
 0x1d6   :  { %v289_v22 = vrot.slane %v284_v21, 6  ;;  %v872_v23 = vpop.f32.mrb[3].mxu0 }
 0x1d8   :  { %v291_v24 = vadd.f32 %v289_v22, %v127_v16 }
 0x1da   :  { %995 = vtanh.f32 %v291_v24 }
 0x1e4   :  { %v996_v25 = vpop.eup %995 }
 0x1e5   :  { %v294_v26 = vrot.slane %v996_v25, 2 }
 0x1e7   :  { %882 = vmatmul.mubr.msk.f32.vlgmr.msra.gmra.mrb[2].mxu1 %vm139_vm3, %v294_v26 }
 0x1e8   :  { %965 = vmatpush3.bf16.msra.mxu1 %v1095_v6  ;;  %903 = vmatprep.mubr.msk.f32.mxu1 %vm1037_vm0, %v1038_v2 }
 0x1e9   :  { %966 = vmatprep.subr.bf16.mxu1 %v1036_v1 }
 0x1ec   :  { %968 = vmatpush3.bf16.msra.mxu1 %v1104_v11 }
 0x1ed   :  { %975 = vmatprep.subr.bf16.mxu1 %v1036_v1 }
 0x2ba   :  { %v363_v27 = vpop.f32.mrb[2].mxu1 }
 0x2bb   :  { %v368_v28 = vrot.slane %v363_v27, 4  ;;  %v883_v29 = vpop.f32.mrb[3].mxu1 }
 0x2bd   :  { %v370_v30 = vadd.f32 %v368_v28, %v127_v16 }
 0x2bf   :  { %997 = vtanh.f32 %v370_v30 }
 0x2c9   :  { %v998_v31 = vpop.eup %997 }
 0x2ca   :  { %v373_v32 = vrot.slane %v998_v31, 4 }
 0x2cc   :  { %893 = vmatmul.mubr.msk.f32.vlgmr.msra.gmra.mrb[4].mxu0 %vm139_vm3, %v373_v32 }
 0x2cd   :  { %971 = vmatpush3.bf16.msra.mxu0 %v1095_v6  ;;  %914 = vmatprep.mubr.msk.f32.mxu0 %vm1037_vm0, %v1038_v2 }
 0x2ce   :  { %972 = vmatprep.subr.bf16.mxu0 %v1036_v1 }
 0x2d1   :  { %974 = vmatpush3.bf16.msra.mxu0 %v1104_v11 }
 0x2d2   :  { %981 = vmatprep.subr.bf16.mxu0 %v1036_v1 }
 0x39f   :  { %v442_v33 = vpop.f32.mrb[4].mxu0 }
 0x3a0   :  { %v447_v34 = vrot.slane %v442_v33, 2  ;;  %v894_v35 = vpop.f32.mrb[5].mxu0 }
 0x3a2   :  { %v449_v36 = vadd.f32 %v447_v34, %v127_v16 }
 0x3a4   :  { %999 = vtanh.f32 %v449_v36 }
 0x3ae   :  { %v1000_v37 = vpop.eup %999 }
 0x3af   :  { %v452_v38 = vrot.slane %v1000_v37, 6 }
 0x3b1   :  { %904 = vmatmul.mubr.msk.f32.vlgmr.msra.gmra.mrb[4].mxu1 %vm139_vm3, %v452_v38 }
 0x3b2   :  { %977 = vmatpush3.bf16.msra.mxu1 %v1095_v6  ;;  %925 = vmatprep.mubr.msk.f32.mxu1 %vm1037_vm0, %v1038_v2 }
 0x3b3   :  { %978 = vmatprep.subr.bf16.mxu1 %v1036_v1 }
 0x3b6   :  { %980 = vmatpush3.bf16.msra.mxu1 %v1104_v11 }
 0x484   :  { %v521_v39 = vpop.f32.mrb[4].mxu1 }
 0x485   :  { %v525_v40 = vadd.f32 %v521_v39, %v1126_v14  ;;  %v905_v41 = vpop.f32.mrb[5].mxu1 }
 0x487   :  { %1001 = vtanh.f32 %v525_v40 }
 0x491   :  { %v1002_v42 = vpop.eup %1001 }
 0x492   :  { %915 = vmatmul.mubr.msk.f32.vlgmr.msra.gmra.mrb[6].mxu0 %vm139_vm3, %v1002_v42 }
 0x493   :  { %983 = vmatpush3.bf16.msra.mxu0 %v1095_v6  ;;  %936 = vmatprep.mubr.msk.f32.mxu0 %vm1037_vm0, %v1038_v2 }
 0x494   :  { %984 = vmatprep.subr.bf16.mxu0 %v1036_v1 }
 0x497   :  { %986 = vmatpush3.bf16.msra.mxu0 %v1104_v11 }
 0x565   :  { %v596_v43 = vpop.f32.mrb[6].mxu0 }
 0x566   :  { %v601_v44 = vrot.slane %v596_v43, 6  ;;  %v916_v45 = vpop.f32.mrb[7].mxu0 }
 0x568   :  { %v603_v46 = vadd.f32 %v601_v44, %v1126_v14 }
 0x56a   :  { %1003 = vtanh.f32 %v603_v46 }
 0x574   :  { %v1004_v47 = vpop.eup %1003 }
 0x575   :  { %v606_v48 = vrot.slane %v1004_v47, 2 }
 0x577   :  { %926 = vmatmul.mubr.msk.f32.vlgmr.msra.gmra.mrb[6].mxu1 %vm139_vm3, %v606_v48 }
 0x64a   :  { %v675_v49 = vpop.f32.mrb[6].mxu1 }
 0x64b   :  { %v680_v50 = vrot.slane %v675_v49, 4  ;;  %v927_v51 = vpop.f32.mrb[7].mxu1 }
 0x64d   :  { %v682_v52 = vadd.f32 %v680_v50, %v1126_v14 }
 0x64f   :  { %1005 = vtanh.f32 %v682_v52 }
 0x659   :  { %v1006_v53 = vpop.eup %1005 }
 0x65a   :  { %v685_v54 = vrot.slane %v1006_v53, 4 }
 0x65c   :  { %937 = vmatmul.mubr.msk.f32.vlgmr.msra.gmra.mrb[8].mxu0 %vm139_vm3, %v685_v54 }
 0x72f   :  { %v754_v55 = vpop.f32.mrb[8].mxu0 }
 0x730   :  { %v759_v56 = vrot.slane %v754_v55, 2  ;;  %v938_v57 = vpop.f32.mrb[9].mxu0 }
 0x732   :  { %v761_v58 = vadd.f32 %v759_v56, %v1126_v14 }
 0x734   :  { %1007 = vtanh.f32 %v761_v58 }
 0x73e   :  { %v1008_v60 = vpop.eup %1007 }
 0x73f   :  { %v770_v61 = vmul.f32 %v1008_v60, %v801_v59 }
 0x741   :  { %v772_v62 = vsel %vm771_vm4, %v770_v61, 0.0 }
 0x742   :  { %773 = vadd.xlane.f32.xlu0 %v772_v62 }
 0x7cf   :  { %v774_v0 = vpop.xlane.xlu0 %773 }
 0x7d0   :  { %v782_v1 = vadd.f32 %v802_v63, %v774_v0 }
 0x7d2   :  { %784 = vst.msk [vmem:[%s1179_s6 - $0x6] sm:$0xc0] %vm783_vm5, %v782_v1 }
 0x7d3   :  { %789 = vsyncpa [#allocation4], 1 }

</bundles_post_ra>
